<compile_context>
chip_gen: v7x
topology: tpu7x:2x2x1
jax: 0.10.0
libtpu: 0.0.40
codegen_flags: <defaults>
</compile_context>

<pallas_src>
import jax
import jax.numpy as jnp
from jax.experimental import pallas as pl
from jax.experimental.pallas import tpu as pltpu


# ----------------------------- Pallas kernel -------------------------------

def _chomp_kernel(x_ref, o_ref):
    # x_ref: (B*C, L) slab in VMEM; o_ref: (B*C, L - chomp_size).
    # Static slice along the lane (length) axis, then a single dense store.
    l_out = o_ref.shape[-1]
    o_ref[...] = x_ref[...][:, :l_out]


# --------------------------- Python wrapper ---------------------------------

def chomp1d(x, chomp_size):
    """Equivalent of PyTorch Chomp1d: x[:, :, :-chomp_size].contiguous().

    x: (B, C, L) -> (B, C, L - chomp_size).
    Implemented as one pallas_call over the whole (B*C, L) slab: a single
    launch, a single grid step, and a contiguous (lane-major) output write.
    """
    B, C, L = x.shape
    if not (0 < chomp_size < L):
        raise ValueError("chomp_size must satisfy 0 < chomp_size < L")
    L_out = L - chomp_size

    # Collapse batch/channel into rows (sublanes); keep length on lanes.
    x2d = x.reshape(B * C, L)

    out2d = pl.pallas_call(
        _chomp_kernel,
        out_shape=jax.ShapeDtypeStruct((B * C, L_out), x.dtype),
        grid=(1,),
        in_specs=[pl.BlockSpec((B * C, L), lambda i: (0, 0))],
        out_specs=pl.BlockSpec((B * C, L_out), lambda i: (0, 0)),
        compiler_params=pltpu.CompilerParams(
            dimension_semantics=("arbitrary",)
        ),
    )(x2d)

    # .contiguous() in PyTorch -> output is already a freshly materialized array.
    return out2d.reshape(B, C, L_out)


# ------------------------ pure-JAX reference (check) ------------------------

def _reference_chomp1d(x, chomp_size):
    return x[:, :, :-chomp_size]


# ---------------------------------- main ------------------------------------

if __name__ == "__main__":
    batch, channels, length = 2, 4, 16
    chomp_size = 2

    key = jax.random.PRNGKey(0)
    x = jax.random.normal(key, (batch, channels, length), jnp.float32)

    out = chomp1d(x, chomp_size)
    out = jax.block_until_ready(out)

    ref = _reference_chomp1d(x, chomp_size)
    assert out.shape == (batch, channels, length - chomp_size)
    assert jnp.array_equal(out, ref)

    print("KERNEL_OK")
</pallas_src>

<mosaic_0001>
module attributes {stable_mosaic.version = 11 : i64} {
  func.func @_chomp_kernel(%arg0: i32, %arg1: memref<8x16xf32, #tpu.memory_space<vmem>>, %arg2: memref<8x14xf32, #tpu.memory_space<vmem>>) attributes {dimension_semantics = [#tpu.dimension_semantics<arbitrary>], iteration_bounds = array<i64: 1>, scalar_prefetch = 0 : i64, scratch_operands = 0 : i64, tpu.core_type = #tpu.core_type<tc>, window_params = [{pipeline_mode = #tpu.pipeline_mode<synchronous>, transform_indices = @transform_0, window_bounds = array<i64: 8, 16>}, {pipeline_mode = #tpu.pipeline_mode<synchronous>, transform_indices = @transform_1, window_bounds = array<i64: 8, 14>}]} {
    %c0 = arith.constant 0 : index
    %c0_0 = arith.constant 0 : index
    %0 = vector.load %arg1[%c0, %c0_0] : memref<8x16xf32, #tpu.memory_space<vmem>>, vector<8x16xf32>
    %1 = vector.extract_strided_slice %0 {offsets = [0, 0], sizes = [8, 14], strides = [1, 1]} : vector<8x16xf32> to vector<8x14xf32>
    %c0_1 = arith.constant 0 : index
    %c0_2 = arith.constant 0 : index
    %2 = vector.load %arg2[%c0_1, %c0_2] : memref<8x14xf32, #tpu.memory_space<vmem>>, vector<8x14xf32>
    tpu.vector_store %arg2[%c0_1, %c0_2], %1 {strides = array<i32>} : memref<8x14xf32, #tpu.memory_space<vmem>>, vector<8x14xf32>,
    return
  }
  func.func @transform_0(%arg0: i32) -> (i32, i32) {
    %c0_i32 = arith.constant 0 : i32
    %c0_i32_0 = arith.constant 0 : i32
    %c0_i32_1 = arith.constant 0 : i32
    return %c0_i32, %c0_i32_0 : i32, i32
  }
  func.func @transform_1(%arg0: i32) -> (i32, i32) {
    %c0_i32 = arith.constant 0 : i32
    %c0_i32_0 = arith.constant 0 : i32
    %c0_i32_1 = arith.constant 0 : i32
    return %c0_i32, %c0_i32_0 : i32, i32
  }
}

</mosaic_0001>

<bundles_post_ra>
// kernel: tpu_custom_call.1
= control target key start
LH: loop header
LB: loop body
LE: loop exit
PB: predicated region body
PF: predicated region fallthrough
CT: control target
= control target key end

     0   :  { %6 = vsyncpa [#allocation3], 0  ;;  %s125_s0 = inlined_call_operand.hbm [shape: f32[8,16], index: 0, kind: input, shape index: {}]   ;;  %s126_s1 = inlined_call_operand.hbm [shape: f32[8,14], index: 1, kind: output, shape index: {}]  }
   0x1   :  { %7 = vsyncpa [#allocation4], 0  ;;  %s89_s6 = smov [#allocation2]   ;;  %s41_s10 = scalar_lea.hbm %s125_s0, 128 }
   0x2   :  { %s14_s7 = sshll.u32 %s89_s6, 4  ;;  %p42_p0 = scmp.ne.s32.totalorder %s125_s0, %s41_s10  ;;  %s15_s7 = int_to_ptr.vmem [resolvable:$true] %s14_s7 }
   0x3   :  { %p45_p1 = scmp.lt.u32.totalorder %s41_s10, %s125_s0 }
   0x5   :  { %p47_p2 = pnand %p45_p1, %p42_p0 }
   0x7   :  { %50 = shalt.err (!%p47_p2)
}
   0x8   :  { %s51_s15 = scalar_lea.vmem %s15_s7, 128  ;;  %p56_p4 = scmp.lt.s32.totalorder %s15_s7, %s15_s7 }
   0x9   :  { %p52_p3 = scmp.ne.s32.totalorder %s15_s7, %s51_s15  ;;  %p57_p5 = scmp.lt.s32.totalorder %s51_s15, %s51_s15 }
   0xb   :  { %p58_p6 = por %p57_p5, %p56_p4 }
   0xd   :  { %p59_p7 = pnand %p58_p6, %p52_p3 }
   0xf   :  { %62 = shalt.err (!%p59_p7)
}
  0x10   :  { %17 = dma.hbm_to_vmem [thread:$0]  %s125_s0, 128, %s15_s7, [#allocation3]  }
  0x11   :  { %85 = dma.done.wait [#allocation3], 128  }
  0x12   :  { %86 = vsyncadd [#allocation3], 4294967168  ;;  %s90_s18 = smov [#allocation5]   ;;  %vm22_vm0 = vcmask 113664   ;;  %v21_v0 = vld [vmem:[#allocation2] sm:$0xff] }
  0x13   :  { %s30_s19 = sshll.u32 %s90_s18, 4  ;;  %23 = vst.msk [vmem:[#allocation5] sm:$0xff] %vm22_vm0, %v21_v0  ;;  %s31_s19 = int_to_ptr.vmem [resolvable:$true] %s30_s19 }
  0x14   :  { %s63_s20 = scalar_lea.vmem %s31_s19, 128  ;;  %p68_p9 = scmp.lt.s32.totalorder %s31_s19, %s31_s19 }
  0x15   :  { %p64_p8 = scmp.ne.s32.totalorder %s31_s19, %s63_s20  ;;  %p69_p10 = scmp.lt.s32.totalorder %s63_s20, %s63_s20 }
  0x17   :  { %p70_p11 = por %p69_p10, %p68_p9 }
  0x19   :  { %p71_p12 = pnand %p70_p11, %p64_p8 }
  0x1b   :  { %74 = shalt.err (!%p71_p12)
}
  0x1c   :  { %s75_s23 = scalar_lea.hbm %s126_s1, 128 }
  0x1d   :  { %p76_p13 = scmp.ne.s32.totalorder %s126_s1, %s75_s23  ;;  %p79_p0 = scmp.lt.u32.totalorder %s75_s23, %s126_s1 }
  0x1f   :  { %p81_p1 = pnand %p79_p0, %p76_p13 }
  0x21   :  { %84 = shalt.err (!%p81_p1)
}
  0x22   :  { %33 = dma.vmem_to_hbm [thread:$0]  %s31_s19, 128, %s126_s1, [#allocation4]  }
  0x23   :  { %87 = dma.done.wait [#allocation4], 128  }
  0x24   :  { %88 = vsyncadd [#allocation4], 4294967168 }
  0x25   :  { %37 = vsyncpa [#allocation3], 1 }
  0x26   :  { %38 = vsyncpa [#allocation4], 1 }

</bundles_post_ra>
